<compile_context>
chip_gen: v7x
topology: tpu7x:2x2x1
jax: 0.10.0
libtpu: 0.0.40
codegen_flags: <defaults>
</compile_context>

<pallas_src>
import functools
import numpy as np
import jax
import jax.numpy as jnp
from jax import lax
from jax.experimental import pallas as pl
from jax.experimental.pallas import tpu as pltpu

_EPS = 1e-5
_VMEM_LIMIT = 48 * 1024 * 1024           # safe on v7x (64 MiB physical)
_W_RESIDENT_BYTES = 8 * 1024 * 1024      # keep weights VMEM-resident below this


def _cdiv(a, b):
    return -(-a // b)


def _round_up(x, m):
    return _cdiv(x, m) * m


def _pad2d(x, rows, cols):
    if x.shape[0] == rows and x.shape[1] == cols:
        return x
    return jnp.pad(x, ((0, rows - x.shape[0]), (0, cols - x.shape[1])))


def _split_dim(dim, cap, align):
    """Pick (tile, padded_dim): prefer tiles <= cap, then least padding, then
    the largest such tile (split-first, round-second — avoids the old
    round_up(dim, fixed_tile) padding blowup)."""
    best = None
    max_n = max(1, _cdiv(dim, align))
    for n in range(1, max_n + 1):
        t = _round_up(_cdiv(dim, n), align)
        p = _round_up(dim, t)
        key = (t > cap, p, -t)
        if best is None or key < best[0]:
            best = (key, t, p)
    return best[1], best[2]


# ------------------------------ Pallas kernel -------------------------------

def _fused_gemm_kernel(*refs, has_res, full_relu, use_scratch, w_resident,
                       tk, tn):
    """Tiled GEMM with fused BN affine + optional residual + (masked) ReLU.

    grid = (M//tm, N//tn, K//tk); K is the innermost (reduction) axis.
    refs = p, w, ssm, [residual], out, [acc_scratch]
    ssm rows: 0 = scale, 1 = shift, 2 = relu mask (only read if not full_relu).
    """
    idx = 0
    p_ref = refs[idx]; idx += 1
    w_ref = refs[idx]; idx += 1
    ssm_ref = refs[idx]; idx += 1
    r_ref = None
    if has_res:
        r_ref = refs[idx]; idx += 1
    o_ref = refs[idx]; idx += 1
    acc_ref = refs[idx] if use_scratch else o_ref

    @pl.when(pl.program_id(2) == 0)
    def _():
        acc_ref[...] = jnp.zeros_like(acc_ref)

    if w_resident:
        # Weight is a single VMEM-resident block; slice the (tk, tn) tile.
        k0 = pl.multiple_of(pl.program_id(2) * tk, 128)
        j0 = pl.multiple_of(pl.program_id(1) * tn, 128)
        w = w_ref[pl.ds(k0, tk), pl.ds(j0, tn)]
    else:
        w = w_ref[...]

    # bf16 x bf16 -> f32 accumulation on the MXU.
    acc_ref[...] += jnp.dot(p_ref[...], w, preferred_element_type=jnp.float32)

    @pl.when(pl.program_id(2) == pl.num_programs(2) - 1)
    def _():
        ssm = ssm_ref[...]
        out = acc_ref[...] * ssm[0:1, :] + ssm[1:2, :]      # folded BN + bias
        if has_res:
            out = out + r_ref[...].astype(jnp.float32)      # residual add
        if full_relu:
            out = jnp.maximum(out, 0.0)
        else:
            m = ssm[2:3, :]                                 # per-column ReLU mask
            out = jnp.maximum(out, out * (1.0 - m))
        o_ref[...] = out.astype(o_ref.dtype)


def fused_gemm(p, w, scale, shift, relu_mask=None, residual=None,
               out_dtype=jnp.float32,
               tm_cap=512, tn_cap=256, tk_cap=2048):
    """(M,K)@(K,N) * scale + shift [+ residual] [(masked) ReLU] -> (M,N)."""
    M, K = p.shape
    N = w.shape[1]

    tm, Mp = _split_dim(M, tm_cap, 16)     # bf16 LHS sublane dim -> align 16
    tn, Np = _split_dim(N, tn_cap, 128)    # lane dim -> align 128
    tk, Kp = _split_dim(K, tk_cap, 128)    # LHS lane / RHS sublane -> align 128

    # Keep >=2 programs on the parallel axes so v7x's 2 TensorCores both work.
    if (Mp // tm) * (Np // tn) < 2 and M > 16:
        tm = _round_up(_cdiv(M, 2), 16)
        Mp = _round_up(M, tm)

    w_resident = (Kp * Np * 2) <= _W_RESIDENT_BYTES
    use_scratch = (jnp.dtype(out_dtype) != jnp.dtype(jnp.float32))
    full_relu = relu_mask is None

    # Pack scale / shift / mask into one (8, Np) f32 operand (rows 0..2).
    ssm = jnp.zeros((8, Np), jnp.float32)
    ssm = ssm.at[0, :N].set(scale.astype(jnp.float32))
    ssm = ssm.at[1, :N].set(shift.astype(jnp.float32))
    if relu_mask is not None:
        ssm = ssm.at[2, :N].set(relu_mask.astype(jnp.float32))

    args = [
        _pad2d(p.astype(jnp.bfloat16), Mp, Kp),
        _pad2d(w.astype(jnp.bfloat16), Kp, Np),
        ssm,
    ]
    in_specs = [
        pl.BlockSpec((tm, tk), lambda i, j, k: (i, k)),
        (pl.BlockSpec((Kp, Np), lambda i, j, k: (0, 0)) if w_resident
         else pl.BlockSpec((tk, tn), lambda i, j, k: (k, j))),
        pl.BlockSpec((8, tn), lambda i, j, k: (0, j)),
    ]
    if residual is not None:
        args.append(_pad2d(residual.astype(jnp.bfloat16), Mp, Np))
        in_specs.append(pl.BlockSpec((tm, tn), lambda i, j, k: (i, j)))

    kernel = functools.partial(
        _fused_gemm_kernel,
        has_res=residual is not None, full_relu=full_relu,
        use_scratch=use_scratch, w_resident=w_resident, tk=tk, tn=tn)

    out = pl.pallas_call(
        kernel,
        out_shape=jax.ShapeDtypeStruct((Mp, Np), out_dtype),
        grid=(Mp // tm, Np // tn, Kp // tk),
        in_specs=in_specs,
        out_specs=pl.BlockSpec((tm, tn), lambda i, j, k: (i, j)),
        scratch_shapes=([pltpu.VMEM((tm, tn), jnp.float32)]
                        if use_scratch else []),
        compiler_params=pltpu.CompilerParams(
            dimension_semantics=("parallel", "parallel", "arbitrary"),
            vmem_limit_bytes=_VMEM_LIMIT),
    )(*args)

    if Mp == M and Np == N:
        return out
    return out[:M, :N]


# ----------------------------- JAX glue (layout) -----------------------------

def _im2col(x, stride):
    """x: (B,H,W,C) NHWC (bf16), 3x3 kernel, pad=1 -> (B*Ho*Wo, 9*C),
    K ordered (kh, kw, cin)."""
    B, H, W, C = x.shape
    Ho = (H + 2 - 3) // stride + 1
    Wo = (W + 2 - 3) // stride + 1
    xp = jnp.pad(x, ((0, 0), (1, 1), (1, 1), (0, 0)))
    cols = []
    for kh in range(3):
        for kw in range(3):
            cols.append(xp[:, kh:kh + (Ho - 1) * stride + 1:stride,
                           kw:kw + (Wo - 1) * stride + 1:stride, :])
    patches = jnp.stack(cols, axis=3)                  # (B, Ho, Wo, 9, C)
    return patches.reshape(B * Ho * Wo, 9 * C), Ho, Wo


def _conv_w_to_mat(w):
    # PyTorch OIHW (Cout,Cin,3,3) -> GEMM matrix (9*Cin, Cout), rows (kh,kw,cin)
    cout, cin = w.shape[0], w.shape[1]
    return jnp.transpose(w, (2, 3, 1, 0)).reshape(9 * cin, cout)


def _fold_bn(gamma, beta, running_mean, running_var, conv_bias):
    # eval-mode BN with running stats, conv bias folded in:
    #   BN(conv(x)+b) = conv(x)*scale + (beta + (b - mean)*scale)
    scale = gamma / jnp.sqrt(running_var + _EPS)
    shift = beta + (conv_bias - running_mean) * scale
    return scale, shift


# ------------------------------ ResBlock forward ----------------------------

def resblock_forward(x_nchw, params, stride=2):
    x = jnp.transpose(x_nchw, (0, 2, 3, 1)).astype(jnp.bfloat16)   # -> NHWC bf16
    B, H, W, Cin = x.shape
    Cout = params["conv1_w"].shape[0]

    patches, Ho, Wo = _im2col(x, stride)                           # (M, 9*Cin) bf16

    s1, b1 = _fold_bn(params["bn1_g"], params["bn1_b"],
                      params["bn1_rm"], params["bn1_rv"], params["conv1_b"])
    w1 = _conv_w_to_mat(params["conv1_w"])

    diff = (stride != 1) or (Cin != Cout)
    if diff:
        # Fuse conv_1(+bn_1+ReLU) and conv_3(+bn_3) into ONE GEMM (concat on N).
        s3, b3 = _fold_bn(params["bn3_g"], params["bn3_b"],
                          params["bn3_rm"], params["bn3_rv"], params["conv3_b"])
        w3 = _conv_w_to_mat(params["conv3_w"])
        w_cat = jnp.concatenate([w1, w3], axis=1)                  # (9*Cin, 2*Cout)
        s_cat = jnp.concatenate([s1, s3])
        b_cat = jnp.concatenate([b1, b3])
        mask = jnp.concatenate([jnp.ones((Cout,), jnp.float32),    # ReLU conv1 only
                                jnp.zeros((Cout,), jnp.float32)])
        combined = fused_gemm(patches, w_cat, s_cat, b_cat, relu_mask=mask,
                              out_dtype=jnp.bfloat16)              # (M, 2*Cout) bf16
        h1 = combined[:, :Cout]
        shortcut = combined[:, Cout:]
    else:
        # TODO(synk): identity-shortcut branch is not exercised by the test below.
        h1 = fused_gemm(patches, w1, s1, b1, out_dtype=jnp.bfloat16)
        shortcut = x.reshape(B * Ho * Wo, Cout)                    # identity, bf16

    # conv_2 -> bn_2, + shortcut, ReLU — all fused in the GEMM epilogue.
    h1_nhwc = h1.reshape(B, Ho, Wo, Cout)
    patches2, _, _ = _im2col(h1_nhwc, 1)                           # (M, 9*Cout) bf16
    s2, b2 = _fold_bn(params["bn2_g"], params["bn2_b"],
                      params["bn2_rm"], params["bn2_rv"], params["conv2_b"])
    out = fused_gemm(patches2, _conv_w_to_mat(params["conv2_w"]), s2, b2,
                     residual=shortcut, out_dtype=jnp.float32)
    out = out.reshape(B, Ho, Wo, Cout)
    return jnp.transpose(out, (0, 3, 1, 2)).astype(jnp.float32)    # -> NCHW


# --------------------------- pure-JAX reference ------------------------------

def _ref_conv_bn(x, w, b, g, beta, rm, rv, stride):
    # Matches kernel numerics: bf16 conv operands, f32 accumulation, f32 BN.
    y = lax.conv_general_dilated(
        x.astype(jnp.bfloat16), w.astype(jnp.bfloat16),
        window_strides=(stride, stride), padding=((1, 1), (1, 1)),
        dimension_numbers=("NCHW", "OIHW", "NCHW"),
        preferred_element_type=jnp.float32)
    y = y + b[None, :, None, None]
    scale = (g / jnp.sqrt(rv + _EPS))
    return (y - rm[None, :, None, None]) * scale[None, :, None, None] \
        + beta[None, :, None, None]


def ref_resblock(x_nchw, p, stride=2):
    # Mirror the kernel's bf16 storage of input / h1 / shortcut.
    xq = x_nchw.astype(jnp.bfloat16).astype(jnp.float32)
    h = jax.nn.relu(_ref_conv_bn(xq, p["conv1_w"], p["conv1_b"],
                                 p["bn1_g"], p["bn1_b"], p["bn1_rm"], p["bn1_rv"],
                                 stride))
    h = h.astype(jnp.bfloat16).astype(jnp.float32)
    h = _ref_conv_bn(h, p["conv2_w"], p["conv2_b"],
                     p["bn2_g"], p["bn2_b"], p["bn2_rm"], p["bn2_rv"], 1)
    sc = _ref_conv_bn(xq, p["conv3_w"], p["conv3_b"],
                      p["bn3_g"], p["bn3_b"], p["bn3_rm"], p["bn3_rv"], stride)
    sc = sc.astype(jnp.bfloat16).astype(jnp.float32)
    return jax.nn.relu(sc + h)


# ----------------------- deterministic parameter init ------------------------

def init_params(key, cin, cout):
    ks = iter(jax.random.split(key, 32))

    def conv(ci, co):
        w = jax.random.normal(next(ks), (co, ci, 3, 3), jnp.float32) / np.sqrt(9.0 * ci)
        b = 0.05 * jax.random.normal(next(ks), (co,), jnp.float32)
        return w, b

    def bn(c):
        g = 1.0 + 0.1 * jax.random.normal(next(ks), (c,), jnp.float32)
        b = 0.1 * jax.random.normal(next(ks), (c,), jnp.float32)
        rm = 0.1 * jax.random.normal(next(ks), (c,), jnp.float32)
        rv = 0.5 + jax.random.uniform(next(ks), (c,), jnp.float32)  # positive var
        return g, b, rm, rv

    p = {}
    p["conv1_w"], p["conv1_b"] = conv(cin, cout)
    p["bn1_g"], p["bn1_b"], p["bn1_rm"], p["bn1_rv"] = bn(cout)
    p["conv2_w"], p["conv2_b"] = conv(cout, cout)
    p["bn2_g"], p["bn2_b"], p["bn2_rm"], p["bn2_rv"] = bn(cout)
    p["conv3_w"], p["conv3_b"] = conv(cin, cout)
    p["bn3_g"], p["bn3_b"], p["bn3_rm"], p["bn3_rv"] = bn(cout)
    return p


if __name__ == "__main__":
    key = jax.random.PRNGKey(0)
    kx, kp = jax.random.split(key)

    # Small shapes: batch=2, Cin=4, Cout=8, spatial=16, stride=2 -> (2, 8, 8, 8)
    x = jax.random.normal(kx, (2, 4, 16, 16), jnp.float32)
    params = init_params(kp, cin=4, cout=8)

    fwd = jax.jit(functools.partial(resblock_forward, params=params, stride=2))
    out = fwd(x)
    jax.block_until_ready(out)

    assert out.shape == (2, 8, 8, 8), out.shape
    assert bool(jnp.all(jnp.isfinite(out)))

    ref = ref_resblock(x, params, stride=2)
    # Loose-ish tolerance: MXU inputs and intermediates are bf16 (f32 accumulation).
    assert bool(jnp.allclose(out, ref, atol=2e-2, rtol=2e-2)), \
        float(jnp.max(jnp.abs(out - ref)))

    print("KERNEL_OK")
</pallas_src>

<mosaic_0001>
module attributes {stable_mosaic.version = 11 : i64} {
  func.func @_fused_gemm_kernel(%arg0: i32, %arg1: i32, %arg2: i32, %arg3: memref<64x128xbf16, #tpu.memory_space<vmem>>, %arg4: memref<128x128xbf16, #tpu.memory_space<vmem>>, %arg5: memref<8x128xf32, #tpu.memory_space<vmem>>, %arg6: memref<64x128xbf16, #tpu.memory_space<vmem>>, %arg7: memref<64x128xf32, #tpu.memory_space<vmem>>) attributes {dimension_semantics = [#tpu.dimension_semantics<parallel>, #tpu.dimension_semantics<parallel>, #tpu.dimension_semantics<arbitrary>], iteration_bounds = array<i64: 2, 1, 1>, scalar_prefetch = 0 : i64, scratch_operands = 1 : i64, tpu.core_type = #tpu.core_type<tc>, window_params = [{transform_indices = @transform_0, window_bounds = array<i64: 64, 128>}, {pipeline_mode = #tpu.pipeline_mode<synchronous>, transform_indices = @transform_1, window_bounds = array<i64: 128, 128>}, {transform_indices = @transform_2, window_bounds = array<i64: 8, 128>}, {transform_indices = @transform_3, window_bounds = array<i64: 64, 128>}]} {
    %c0_i32 = arith.constant 0 : i32
    %0 = arith.cmpi eq, %arg2, %c0_i32 : i32
    %1 = arith.extui %0 : i1 to i32
    %c0_i32_0 = arith.constant 0 : i32
    %2 = arith.cmpi ne, %1, %c0_i32_0 : i32
    scf.if %2 {
      %cst_9 = arith.constant 0.000000e+00 : f32
      %18 = vector.broadcast %cst_9 : f32 to vector<64x128xf32>
      %c0_10 = arith.constant 0 : index
      %c0_11 = arith.constant 0 : index
      %19 = vector.load %arg7[%c0_10, %c0_11] : memref<64x128xf32, #tpu.memory_space<vmem>>, vector<64x128xf32>
      tpu.vector_store %arg7[%c0_10, %c0_11], %18 {strides = array<i32>} : memref<64x128xf32, #tpu.memory_space<vmem>>, vector<64x128xf32>,
    } else {
    }
    %c128_i32 = arith.constant 128 : i32
    %3 = arith.muli %arg2, %c128_i32 : i32
    %4 = tpu.assume_multiple %3, 128 : i32
    %c128_i32_1 = arith.constant 128 : i32
    %5 = arith.muli %arg1, %c128_i32_1 : i32
    %6 = tpu.assume_multiple %5, 128 : i32
    %7 = arith.index_cast %4 : i32 to index
    %8 = arith.index_cast %6 : i32 to index
    %9 = vector.load %arg4[%7, %8] : memref<128x128xbf16, #tpu.memory_space<vmem>>, vector<128x128xbf16>
    %c0 = arith.constant 0 : index
    %c0_2 = arith.constant 0 : index
    %10 = vector.load %arg7[%c0, %c0_2] : memref<64x128xf32, #tpu.memory_space<vmem>>, vector<64x128xf32>
    %c0_3 = arith.constant 0 : index
    %c0_4 = arith.constant 0 : index
    %11 = vector.load %arg3[%c0_3, %c0_4] : memref<64x128xbf16, #tpu.memory_space<vmem>>, vector<64x128xbf16>
    %cst = arith.constant dense<0.000000e+00> : vector<64x128xf32>
    %12 = tpu.matmul %11, %9, %cst {dimension_numbers = #tpu.dot_dimension_numbers<[1], [0], [0], [1], [0, 0, 1, 1], [], []>} : vector<64x128xbf16>, vector<128x128xbf16>, vector<64x128xf32> -> vector<64x128xf32>
    %13 = arith.addf %10, %12 : vector<64x128xf32>
    %c0_5 = arith.constant 0 : index
    %c0_6 = arith.constant 0 : index
    %14 = vector.load %arg7[%c0_5, %c0_6] : memref<64x128xf32, #tpu.memory_space<vmem>>, vector<64x128xf32>
    tpu.vector_store %arg7[%c0_5, %c0_6], %13 {strides = array<i32>} : memref<64x128xf32, #tpu.memory_space<vmem>>, vector<64x128xf32>,
    %c0_i32_7 = arith.constant 0 : i32
    %15 = arith.cmpi eq, %arg2, %c0_i32_7 : i32
    %16 = arith.extui %15 : i1 to i32
    %c0_i32_8 = arith.constant 0 : i32
    %17 = arith.cmpi ne, %16, %c0_i32_8 : i32
    scf.if %17 {
      %c0_9 = arith.constant 0 : index
      %c0_10 = arith.constant 0 : index
      %18 = vector.load %arg5[%c0_9, %c0_10] : memref<8x128xf32, #tpu.memory_space<vmem>>, vector<8x128xf32>
      %c0_11 = arith.constant 0 : index
      %c0_12 = arith.constant 0 : index
      %19 = vector.load %arg7[%c0_11, %c0_12] : memref<64x128xf32, #tpu.memory_space<vmem>>, vector<64x128xf32>
      %20 = vector.extract_strided_slice %18 {offsets = [0, 0], sizes = [1, 128], strides = [1, 1]} : vector<8x128xf32> to vector<1x128xf32>
      %21 = vector.broadcast %20 : vector<1x128xf32> to vector<64x128xf32>
      %22 = arith.mulf %19, %21 : vector<64x128xf32>
      %23 = vector.extract_strided_slice %18 {offsets = [1, 0], sizes = [1, 128], strides = [1, 1]} : vector<8x128xf32> to vector<1x128xf32>
      %24 = vector.broadcast %23 : vector<1x128xf32> to vector<64x128xf32>
      %25 = arith.addf %22, %24 : vector<64x128xf32>
      %26 = vector.extract_strided_slice %18 {offsets = [2, 0], sizes = [1, 128], strides = [1, 1]} : vector<8x128xf32> to vector<1x128xf32>
      %cst_13 = arith.constant 1.000000e+00 : f32
      %27 = vector.broadcast %cst_13 : f32 to vector<1x128xf32>
      %28 = arith.subf %27, %26 : vector<1x128xf32>
      %29 = vector.broadcast %28 : vector<1x128xf32> to vector<64x128xf32>
      %30 = arith.mulf %25, %29 : vector<64x128xf32>
      %31 = arith.maximumf %25, %30 : vector<64x128xf32>
      %32 = arith.truncf %31 : vector<64x128xf32> to vector<64x128xbf16>
      %c0_14 = arith.constant 0 : index
      %c0_15 = arith.constant 0 : index
      %33 = vector.load %arg6[%c0_14, %c0_15] : memref<64x128xbf16, #tpu.memory_space<vmem>>, vector<64x128xbf16>
      tpu.vector_store %arg6[%c0_14, %c0_15], %32 {strides = array<i32>} : memref<64x128xbf16, #tpu.memory_space<vmem>>, vector<64x128xbf16>,
    } else {
    }
    return
  }
  func.func @transform_0(%arg0: i32, %arg1: i32, %arg2: i32) -> (i32, i32) {
    %c0_i32 = arith.constant 0 : i32
    return %arg0, %arg2 : i32, i32
  }
  func.func @transform_1(%arg0: i32, %arg1: i32, %arg2: i32) -> (i32, i32) {
    %c0_i32 = arith.constant 0 : i32
    %c0_i32_0 = arith.constant 0 : i32
    %c0_i32_1 = arith.constant 0 : i32
    return %c0_i32, %c0_i32_0 : i32, i32
  }
  func.func @transform_2(%arg0: i32, %arg1: i32, %arg2: i32) -> (i32, i32) {
    %c0_i32 = arith.constant 0 : i32
    %c0_i32_0 = arith.constant 0 : i32
    return %c0_i32, %arg1 : i32, i32
  }
  func.func @transform_3(%arg0: i32, %arg1: i32, %arg2: i32) -> (i32, i32) {
    %c0_i32 = arith.constant 0 : i32
    return %arg0, %arg1 : i32, i32
  }
}

module attributes {stable_mosaic.version = 11 : i64} {
  func.func @_fused_gemm_kernel(%arg0: i32, %arg1: i32, %arg2: i32, %arg3: memref<64x128xbf16, #tpu.memory_space<vmem>>, %arg4: memref<128x128xbf16, #tpu.memory_space<vmem>>, %arg5: memref<8x128xf32, #tpu.memory_space<vmem>>, %arg6: memref<64x128xbf16, #tpu.memory_space<vmem>>, %arg7: memref<64x128xf32, #tpu.memory_space<vmem>>) attributes {dimension_semantics = [#tpu.dimension_semantics<parallel>, #tpu.dimension_semantics<parallel>, #tpu.dimension_semantics<arbitrary>], iteration_bounds = array<i64: 2, 1, 1>, scalar_prefetch = 0 : i64, scratch_operands = 0 : i64, tpu.core_type = #tpu.core_type<tc>, window_params = [{transform_indices = @transform_0, window_bounds = array<i64: 64, 128>}, {pipeline_mode = #tpu.pipeline_mode<synchronous>, transform_indices = @transform_1, window_bounds = array<i64: 128, 128>}, {transform_indices = @transform_2, window_bounds = array<i64: 8, 128>}, {transform_indices = @transform_3, window_bounds = array<i64: 64, 128>}, {transform_indices = @transform_4, window_bounds = array<i64: 64, 128>}]} {
    %c0_i32 = arith.constant 0 : i32
    %0 = arith.cmpi eq, %arg2, %c0_i32 : i32
    %1 = arith.extui %0 : i1 to i32
    %c0_i32_0 = arith.constant 0 : i32
    %2 = arith.cmpi ne, %1, %c0_i32_0 : i32
    scf.if %2 {
      %cst_9 = arith.constant 0.000000e+00 : f32
      %18 = vector.broadcast %cst_9 : f32 to vector<64x128xf32>
      %c0_10 = arith.constant 0 : index
      %c0_11 = arith.constant 0 : index
      %19 = vector.load %arg7[%c0_10, %c0_11] : memref<64x128xf32, #tpu.memory_space<vmem>>, vector<64x128xf32>
      tpu.vector_store %arg7[%c0_10, %c0_11], %18 {strides = array<i32>} : memref<64x128xf32, #tpu.memory_space<vmem>>, vector<64x128xf32>,
    } else {
    }
    %c128_i32 = arith.constant 128 : i32
    %3 = arith.muli %arg2, %c128_i32 : i32
    %4 = tpu.assume_multiple %3, 128 : i32
    %c128_i32_1 = arith.constant 128 : i32
    %5 = arith.muli %arg1, %c128_i32_1 : i32
    %6 = tpu.assume_multiple %5, 128 : i32
    %7 = arith.index_cast %4 : i32 to index
    %8 = arith.index_cast %6 : i32 to index
    %9 = vector.load %arg4[%7, %8] : memref<128x128xbf16, #tpu.memory_space<vmem>>, vector<128x128xbf16>
    %c0 = arith.constant 0 : index
    %c0_2 = arith.constant 0 : index
    %10 = vector.load %arg7[%c0, %c0_2] : memref<64x128xf32, #tpu.memory_space<vmem>>, vector<64x128xf32>
    %c0_3 = arith.constant 0 : index
    %c0_4 = arith.constant 0 : index
    %11 = vector.load %arg3[%c0_3, %c0_4] : memref<64x128xbf16, #tpu.memory_space<vmem>>, vector<64x128xbf16>
    %cst = arith.constant dense<0.000000e+00> : vector<64x128xf32>
    %12 = tpu.matmul %11, %9, %cst {dimension_numbers = #tpu.dot_dimension_numbers<[1], [0], [0], [1], [0, 0, 1, 1], [], []>} : vector<64x128xbf16>, vector<128x128xbf16>, vector<64x128xf32> -> vector<64x128xf32>
    %13 = arith.addf %10, %12 : vector<64x128xf32>
    %c0_5 = arith.constant 0 : index
    %c0_6 = arith.constant 0 : index
    %14 = vector.load %arg7[%c0_5, %c0_6] : memref<64x128xf32, #tpu.memory_space<vmem>>, vector<64x128xf32>
    tpu.vector_store %arg7[%c0_5, %c0_6], %13 {strides = array<i32>} : memref<64x128xf32, #tpu.memory_space<vmem>>, vector<64x128xf32>,
    %c0_i32_7 = arith.constant 0 : i32
    %15 = arith.cmpi eq, %arg2, %c0_i32_7 : i32
    %16 = arith.extui %15 : i1 to i32
    %c0_i32_8 = arith.constant 0 : i32
    %17 = arith.cmpi ne, %16, %c0_i32_8 : i32
    scf.if %17 {
      %c0_9 = arith.constant 0 : index
      %c0_10 = arith.constant 0 : index
      %18 = vector.load %arg5[%c0_9, %c0_10] : memref<8x128xf32, #tpu.memory_space<vmem>>, vector<8x128xf32>
      %c0_11 = arith.constant 0 : index
      %c0_12 = arith.constant 0 : index
      %19 = vector.load %arg7[%c0_11, %c0_12] : memref<64x128xf32, #tpu.memory_space<vmem>>, vector<64x128xf32>
      %20 = vector.extract_strided_slice %18 {offsets = [0, 0], sizes = [1, 128], strides = [1, 1]} : vector<8x128xf32> to vector<1x128xf32>
      %21 = vector.broadcast %20 : vector<1x128xf32> to vector<64x128xf32>
      %22 = arith.mulf %19, %21 : vector<64x128xf32>
      %23 = vector.extract_strided_slice %18 {offsets = [1, 0], sizes = [1, 128], strides = [1, 1]} : vector<8x128xf32> to vector<1x128xf32>
      %24 = vector.broadcast %23 : vector<1x128xf32> to vector<64x128xf32>
      %25 = arith.addf %22, %24 : vector<64x128xf32>
      %c0_13 = arith.constant 0 : index
      %c0_14 = arith.constant 0 : index
      %26 = vector.load %arg6[%c0_13, %c0_14] : memref<64x128xbf16, #tpu.memory_space<vmem>>, vector<64x128xbf16>
      %27 = arith.extf %26 : vector<64x128xbf16> to vector<64x128xf32>
      %28 = arith.addf %25, %27 : vector<64x128xf32>
      %cst_15 = arith.constant 0.000000e+00 : f32
      %29 = vector.broadcast %cst_15 : f32 to vector<64x128xf32>
      %30 = arith.maximumf %28, %29 : vector<64x128xf32>
      %c0_16 = arith.constant 0 : index
      %c0_17 = arith.constant 0 : index
      %31 = vector.load %arg7[%c0_16, %c0_17] : memref<64x128xf32, #tpu.memory_space<vmem>>, vector<64x128xf32>
      tpu.vector_store %arg7[%c0_16, %c0_17], %30 {strides = array<i32>} : memref<64x128xf32, #tpu.memory_space<vmem>>, vector<64x128xf32>,
    } else {
    }
    return
  }
  func.func @transform_0(%arg0: i32, %arg1: i32, %arg2: i32) -> (i32, i32) {
    %c0_i32 = arith.constant 0 : i32
    return %arg0, %arg2 : i32, i32
  }
  func.func @transform_1(%arg0: i32, %arg1: i32, %arg2: i32) -> (i32, i32) {
    %c0_i32 = arith.constant 0 : i32
    %c0_i32_0 = arith.constant 0 : i32
    %c0_i32_1 = arith.constant 0 : i32
    return %c0_i32, %c0_i32_0 : i32, i32
  }
  func.func @transform_2(%arg0: i32, %arg1: i32, %arg2: i32) -> (i32, i32) {
    %c0_i32 = arith.constant 0 : i32
    %c0_i32_0 = arith.constant 0 : i32
    return %c0_i32, %arg1 : i32, i32
  }
  func.func @transform_3(%arg0: i32, %arg1: i32, %arg2: i32) -> (i32, i32) {
    %c0_i32 = arith.constant 0 : i32
    return %arg0, %arg1 : i32, i32
  }
  func.func @transform_4(%arg0: i32, %arg1: i32, %arg2: i32) -> (i32, i32) {
    %c0_i32 = arith.constant 0 : i32
    return %arg0, %arg1 : i32, i32
  }
}

</mosaic_0001>

<bundles_post_ra>
// kernel: resblock_forward.2
= control target key start
LH: loop header
LB: loop body
LE: loop exit
PB: predicated region body
PF: predicated region fallthrough
CT: control target
= control target key end

     0   :  { %s827_s12 = smov 0   ;;  %s829_s13 = smov 0   ;;  %s900_s0 = inlined_call_operand.vmem [shape: bf16[128,128], index: 0, kind: input, shape index: {}]   ;;  %s901_s1 = inlined_call_operand.vmem [shape: bf16[128,128], index: 1, kind: input, shape index: {}]   ;;  %s902_s2 = inlined_call_operand.vmem [shape: f32[8,128], index: 2, kind: input, shape index: {}]   ;;  %s903_s3 = inlined_call_operand.vmem [shape: bf16[128,128], index: 3, kind: output, shape index: {}]  }
   0x1   :  { %s831_s14 = smov 0  }
   0x2 LB: > { %s32_s15 = sadd.s32 1, %s801_s13  ;;  %p637_p0 = scmp.ge.s32.totalorder %s805_s14, 1  ;;  %s805_s14 = sphi %s831_s14, %s13_s14   ;;  %s801_s13 = sphi %s829_s13, %s905_s13   ;;  %s797_s12 = sphi %s827_s12, %s904_s12  }
   0x3   : > { %p34_p1 = scmp.ge.s32.totalorder %s32_s15, 2  ;;  %p173_p2 = scmp.lt.s32.totalorder %s805_s14, 3 }
   0x5   : > { %s907_s15 = smov (%p34_p1, %s32_s15), 0  ;;  %p174_p3 = pnand %p637_p0, %p173_p2 }
   0x6   : > { %v771_v0 = vld [vmem:[%s901_s1] sm:$0xff] (!%p174_p3)   ;;  %s638_s18 = sshll.u32 (!%p174_p3), %s797_s12, 3  ;;  %v772_v1 = vld [vmem:[%s901_s1 + $0x8] sm:$0xff] (!%p174_p3)   ;;  %v773_v2 = vld [vmem:[%s901_s1 + $0x10] sm:$0xff] (!%p174_p3)   ;;  %v448_v12 = vlaneseq (!%p174_p3) }
   0x7   : > { %177 = sbr.rel (%p174_p3) target bundleno = 265 (0x109), region = 32  ;;  %p208_p4 = scmp.lt.s32.totalorder (!%p174_p3), %s638_s18, 15  ;;  %707 = vmatprep.subr.bf16.mxu0 (!%p174_p3), %v771_v0  ;;  %731 = vmatprep.subr.bf16.mxu1 (!%p174_p3), %v771_v0  ;;  %v774_v3 = vld [vmem:[%s901_s1 + $0x18] sm:$0xff] (!%p174_p3)   ;;  %v775_v6 = vld [vmem:[%s901_s1 + $0x20] sm:$0xff] (!%p174_p3)   ;;  %v776_v7 = vld [vmem:[%s901_s1 + $0x28] sm:$0xff] (!%p174_p3)  }
   0x8   : > { %708 = vmatpush3.bf16.msra.mxu0 (!%p174_p3), %v771_v0  ;;  %739 = vmatpush3.bf16.msra.mxu1 (!%p174_p3), %v771_v0  ;;  %v777_v8 = vld [vmem:[%s901_s1 + $0x30] sm:$0xff] (!%p174_p3)   ;;  %v778_v9 = vld [vmem:[%s901_s1 + $0x38] sm:$0xff] (!%p174_p3)   ;;  %v449_v13 = vshrl.u32 (!%p174_p3), %v448_v12, 7  ;;  %v439_v15 = vld [vmem:[%s902_s2] sm:$0xff] (!%p174_p3) }
   0x9   : > { %709 = vmatprep.subr.bf16.mxu0 (!%p174_p3), %v772_v1  ;;  %732 = vmatprep.subr.bf16.mxu1 (!%p174_p3), %v772_v1  ;;  %v472_v18 = vsub.f32 (!%p174_p3), 1.0, %v439_v15 }
   0xa   : > { %v450_v14 = vsub.s32 (!%p174_p3), 0, %v449_v13  ;;  %v462_v16 = vsub.s32 (!%p174_p3), 1, %v449_v13  ;;  %v475_v19 = vsub.s32 (!%p174_p3), 2, %v449_v13 }
   0xc   : > { %710 = vmatpush3.bf16.msra.mxu0 (!%p174_p3), %v772_v1  ;;  %740 = vmatpush3.bf16.msra.mxu1 (!%p174_p3), %v772_v1  ;;  %v451_v17 = vrot.slane (!%p174_p3), %v439_v15, %v450_v14  ;;  %v463_v20 = vrot.slane (!%p174_p3), %v439_v15, %v462_v16  ;;  %v476_v24 = vrot.slane (!%p174_p3), %v472_v18, %v475_v19 }
   0xd   : > { %711 = vmatprep.subr.bf16.mxu0 (!%p174_p3), %v773_v2  ;;  %733 = vmatprep.subr.bf16.mxu1 (!%p174_p3), %v773_v2 }
   0xe   : > { %s909_s18 = smov (!%p208_p4, %s638_s18), 15 }
   0xf   : > { %s639_s23 = sshll.u32 %s909_s18, 2 }
  0x10   : > { %s862_s26 = scalar_lea.vmem %s900_s0, %s639_s23  ;;  %712 = vmatpush3.bf16.msra.mxu0 %v773_v2  ;;  %741 = vmatpush3.bf16.msra.mxu1 %v773_v2  ;;  %s227_s17 = scalar_lea.vmem %s903_s3, %s639_s23 }
  0x11   : > { %v779_v4 = vld [vmem:[%s862_s26] sm:$0xff]   ;;  %v780_v5 = vld [vmem:[%s862_s26 + $0x10] sm:$0xff]   ;;  %713 = vmatprep.subr.bf16.mxu0 %v774_v3  ;;  %734 = vmatprep.subr.bf16.mxu1 %v774_v3  ;;  %v781_v10 = vld [vmem:[%s862_s26 + $0x8] sm:$0xff]  }
  0x12   : > { %723 = vmatprep.mubr.bf16.mxu0 %v779_v4  ;;  %727 = vmatprep.mubr.bf16.mxu1 %v780_v5  ;;  %v782_v11 = vld [vmem:[%s862_s26 + $0x18] sm:$0xff]  }
  0x14   : > { %714 = vmatpush3.bf16.msra.mxu0 %v774_v3  ;;  %742 = vmatpush3.bf16.msra.mxu1 %v774_v3 }
  0x15   : > { %715 = vmatprep.subr.bf16.mxu0 %v775_v6  ;;  %735 = vmatprep.subr.bf16.mxu1 %v775_v6 }
  0x18   : > { %716 = vmatpush3.bf16.msra.mxu0 %v775_v6  ;;  %743 = vmatpush3.bf16.msra.mxu1 %v775_v6 }
  0x19   : > { %717 = vmatprep.subr.bf16.mxu0 %v776_v7  ;;  %736 = vmatprep.subr.bf16.mxu1 %v776_v7 }
  0x1c   : > { %718 = vmatpush3.bf16.msra.mxu0 %v776_v7  ;;  %744 = vmatpush3.bf16.msra.mxu1 %v776_v7 }
  0x1d   : > { %719 = vmatprep.subr.bf16.mxu0 %v777_v8  ;;  %737 = vmatprep.subr.bf16.mxu1 %v777_v8 }
  0x20   : > { %720 = vmatpush3.bf16.msra.mxu0 %v777_v8  ;;  %745 = vmatpush3.bf16.msra.mxu1 %v777_v8 }
  0x21   : > { %721 = vmatprep.subr.bf16.mxu0 %v778_v9  ;;  %738 = vmatprep.subr.bf16.mxu1 %v778_v9 }
  0x24   : > { %722 = vmatpush3.bf16.msra.mxu0 %v778_v9  ;;  %746 = vmatpush3.bf16.msra.mxu1 %v778_v9 }
  0x27   : > { %724 = vmatmul.mubr.bf16.vlgmr.msra.gmra.mrb[0].mxu0 %v781_v10  ;;  %728 = vmatmul.mubr.bf16.vlgmr.msra.gmra.mrb[0].mxu1 %v782_v11 }
  0xfa   : > { %v725_v21 = vpop.f32.mrb[0].mxu0  ;;  %v729_v22 = vpop.f32.mrb[0].mxu1 }
  0xfb   : > { %v454_v23 = vmul.f32 %v725_v21, %v451_v17  ;;  %v458_v25 = vmul.f32 %v729_v22, %v451_v17  ;;  %v389_v26 = vpop.f32.mrb[1].mxu0  ;;  %v405_v27 = vpop.f32.mrb[1].mxu1 }
  0xfc   : > { %v452_v28 = vmul.f32 %v451_v17, %v389_v26  ;;  %v456_v29 = vmul.f32 %v451_v17, %v405_v27  ;;  %v726_v30 = vpop.f32.mrb[2].mxu0  ;;  %v730_v31 = vpop.f32.mrb[2].mxu1 }
  0xfd   : > { %v466_v32 = vadd.f32 %v463_v20, %v454_v23  ;;  %v470_v33 = vadd.f32 %v463_v20, %v458_v25  ;;  %v455_v34 = vmul.f32 %v726_v30, %v451_v17  ;;  %v459_v35 = vmul.f32 %v730_v31, %v451_v17  ;;  %v392_v36 = vpop.f32.mrb[3].mxu0  ;;  %v408_v37 = vpop.f32.mrb[3].mxu1 }
  0xfe   : > { %v464_v38 = vadd.f32 %v463_v20, %v452_v28  ;;  %v468_v39 = vadd.f32 %v463_v20, %v456_v29  ;;  %v453_v40 = vmul.f32 %v451_v17, %v392_v36  ;;  %v457_v41 = vmul.f32 %v451_v17, %v408_v37 }
  0xff   : > { %v479_v42 = vmul.f32 %v476_v24, %v466_v32  ;;  %v483_v43 = vmul.f32 %v476_v24, %v470_v33  ;;  %v467_v44 = vadd.f32 %v463_v20, %v455_v34  ;;  %v471_v45 = vadd.f32 %v463_v20, %v459_v35 }
 0x100   : > { %v477_v46 = vmul.f32 %v476_v24, %v464_v38  ;;  %v481_v47 = vmul.f32 %v476_v24, %v468_v39  ;;  %v465_v48 = vadd.f32 %v463_v20, %v453_v40  ;;  %v469_v49 = vadd.f32 %v463_v20, %v457_v41 }
 0x101   : > { %v480_v50 = vmul.f32 %v476_v24, %v467_v44  ;;  %v484_v51 = vmul.f32 %v476_v24, %v471_v45  ;;  %v487_v54 = vmax.f32 %v466_v32, %v479_v42  ;;  %v491_v55 = vmax.f32 %v470_v33, %v483_v43 }
 0x102   : > { %v478_v52 = vmul.f32 %v476_v24, %v465_v48  ;;  %v482_v53 = vmul.f32 %v476_v24, %v469_v49  ;;  %v485_v58 = vmax.f32 %v464_v38, %v477_v46  ;;  %v489_v59 = vmax.f32 %v468_v39, %v481_v47 }
 0x103   : > { %v488_v56 = vmax.f32 %v467_v44, %v480_v50  ;;  %v492_v57 = vmax.f32 %v471_v45, %v484_v51 }
 0x104   : > { %v486_v60 = vmax.f32 %v465_v48, %v478_v52  ;;  %v490_v61 = vmax.f32 %v469_v49, %v482_v53 }
 0x105   : > { %v680_v62 = vpack.c.bf16 %v488_v56, %v487_v54  ;;  %v690_v63 = vpack.c.bf16 %v492_v57, %v491_v55 }
 0x106   : > { %v675_v0 = vpack.c.bf16 %v486_v60, %v485_v58  ;;  %v685_v1 = vpack.c.bf16 %v490_v61, %v489_v59 }
 0x107   : > { %692 = vst [vmem:[%s227_s17 + $0x8] sm:$0xff] %v680_v62   ;;  %694 = vst [vmem:[%s227_s17 + $0x18] sm:$0xff] %v690_v63  }
 0x108   : > { %676 = vst [vmem:[%s227_s17] sm:$0xff] %v675_v0   ;;  %693 = vst [vmem:[%s227_s17 + $0x10] sm:$0xff] %v685_v1  }
 0x109 PF: > { %s13_s14 = sadd.s32 1, %s805_s14   ;;  %s904_s12 = smov %s801_s13 }
 0x10a   : > { %p10_p5 = scmp.ge.s32.totalorder %s13_s14, 4   ;;  %s905_s13 = smov %s907_s15 }
 0x10c   :  { %12 = sbr.rel (!%p10_p5) target bundleno = 2 (0x2), region = 74 }

// kernel: resblock_forward.3
= control target key start
LH: loop header
LB: loop body
LE: loop exit
PB: predicated region body
PF: predicated region fallthrough
CT: control target
= control target key end

     0   :  { %s869_s15 = smov 0   ;;  %s871_s16 = smov 0   ;;  %s946_s0 = inlined_call_operand.vmem [shape: bf16[128,128], index: 0, kind: input, shape index: {}]   ;;  %s947_s1 = inlined_call_operand.vmem [shape: bf16[128,128], index: 1, kind: input, shape index: {}]   ;;  %s948_s2 = inlined_call_operand.vmem [shape: f32[8,128], index: 2, kind: input, shape index: {}]   ;;  %s949_s3 = inlined_call_operand.vmem [shape: bf16[128,128], index: 3, kind: input, shape index: {}]   ;;  %s950_s4 = inlined_call_operand.vmem [shape: f32[128,128], index: 4, kind: output, shape index: {}]  }
   0x1   :  { %s873_s17 = smov 0  }
   0x2 LB: > { %s33_s18 = sadd.s32 1, %s838_s16  ;;  %p691_p0 = scmp.ge.s32.totalorder %s842_s17, 1  ;;  %s842_s17 = sphi %s873_s17, %s14_s17   ;;  %s838_s16 = sphi %s871_s16, %s952_s16   ;;  %s834_s15 = sphi %s869_s15, %s951_s15  }
   0x3   : > { %p35_p1 = scmp.ge.s32.totalorder %s33_s18, 2  ;;  %p214_p2 = scmp.lt.s32.totalorder %s842_s17, 3 }
   0x5   : > { %s954_s18 = smov (%p35_p1, %s33_s18), 0  ;;  %p215_p3 = pnand %p691_p0, %p214_p2 }
   0x6   : > { %v808_v0 = vld [vmem:[%s947_s1] sm:$0xff] (!%p215_p3)   ;;  %s692_s21 = sshll.u32 (!%p215_p3), %s834_s15, 3  ;;  %v809_v1 = vld [vmem:[%s947_s1 + $0x8] sm:$0xff] (!%p215_p3)   ;;  %v810_v2 = vld [vmem:[%s947_s1 + $0x10] sm:$0xff] (!%p215_p3)   ;;  %v508_v12 = vlaneseq (!%p215_p3) }
   0x7   : > { %218 = sbr.rel (%p215_p3) target bundleno = 263 (0x107), region = 36  ;;  %p259_p4 = scmp.lt.s32.totalorder (!%p215_p3), %s692_s21, 15  ;;  %743 = vmatprep.subr.bf16.mxu0 (!%p215_p3), %v808_v0  ;;  %767 = vmatprep.subr.bf16.mxu1 (!%p215_p3), %v808_v0  ;;  %v811_v3 = vld [vmem:[%s947_s1 + $0x18] sm:$0xff] (!%p215_p3)   ;;  %v812_v6 = vld [vmem:[%s947_s1 + $0x20] sm:$0xff] (!%p215_p3)   ;;  %v813_v7 = vld [vmem:[%s947_s1 + $0x28] sm:$0xff] (!%p215_p3)  }
   0x8   : > { %744 = vmatpush3.bf16.msra.mxu0 (!%p215_p3), %v808_v0  ;;  %775 = vmatpush3.bf16.msra.mxu1 (!%p215_p3), %v808_v0  ;;  %v814_v8 = vld [vmem:[%s947_s1 + $0x30] sm:$0xff] (!%p215_p3)   ;;  %v815_v9 = vld [vmem:[%s947_s1 + $0x38] sm:$0xff] (!%p215_p3)   ;;  %v509_v13 = vshrl.u32 (!%p215_p3), %v508_v12, 7  ;;  %v499_v16 = vld [vmem:[%s948_s2] sm:$0xff] (!%p215_p3) }
   0x9   : > { %745 = vmatprep.subr.bf16.mxu0 (!%p215_p3), %v809_v1  ;;  %768 = vmatprep.subr.bf16.mxu1 (!%p215_p3), %v809_v1 }
   0xa   : > { %v510_v14 = vsub.s32 (!%p215_p3), 0, %v509_v13  ;;  %v522_v15 = vsub.s32 (!%p215_p3), 1, %v509_v13 }
   0xc   : > { %746 = vmatpush3.bf16.msra.mxu0 (!%p215_p3), %v809_v1  ;;  %776 = vmatpush3.bf16.msra.mxu1 (!%p215_p3), %v809_v1  ;;  %v511_v21 = vrot.slane (!%p215_p3), %v499_v16, %v510_v14  ;;  %v523_v22 = vrot.slane (!%p215_p3), %v499_v16, %v522_v15 }
   0xd   : > { %747 = vmatprep.subr.bf16.mxu0 (!%p215_p3), %v810_v2  ;;  %769 = vmatprep.subr.bf16.mxu1 (!%p215_p3), %v810_v2 }
   0xe   : > { %s956_s21 = smov (!%p259_p4, %s692_s21), 15 }
   0xf   : > { %s693_s26 = sshll.u32 %s956_s21, 2  ;;  %s697_s23 = sshll.u32 %s956_s21, 3 }
  0x10   : > { %s904_s29 = scalar_lea.vmem %s946_s0, %s693_s26  ;;  %748 = vmatpush3.bf16.msra.mxu0 %v810_v2  ;;  %777 = vmatpush3.bf16.msra.mxu1 %v810_v2  ;;  %s278_s19 = scalar_lea.vmem %s949_s3, %s693_s26 }
  0x11   : > { %v816_v4 = vld [vmem:[%s904_s29] sm:$0xff]   ;;  %v817_v5 = vld [vmem:[%s904_s29 + $0x10] sm:$0xff]   ;;  %749 = vmatprep.subr.bf16.mxu0 %v811_v3  ;;  %770 = vmatprep.subr.bf16.mxu1 %v811_v3  ;;  %v818_v10 = vld [vmem:[%s904_s29 + $0x8] sm:$0xff]   ;;  %s287_s26 = scalar_lea.vmem %s950_s4, %s697_s23 }
  0x12   : > { %759 = vmatprep.mubr.bf16.mxu0 %v816_v4  ;;  %763 = vmatprep.mubr.bf16.mxu1 %v817_v5  ;;  %v819_v11 = vld [vmem:[%s904_s29 + $0x18] sm:$0xff]   ;;  %v728_v17 = vld [vmem:[%s278_s19 + $0x8] sm:$0xff]   ;;  %v713_v19 = vld [vmem:[%s278_s19] sm:$0xff]  }
  0x13   : > { %v730_v18 = vld [vmem:[%s278_s19 + $0x18] sm:$0xff]   ;;  %v729_v20 = vld [vmem:[%s278_s19 + $0x10] sm:$0xff]   ;;  %v718_v24 = vunpack.c.l.bf16 %v728_v17  ;;  %v714_v27 = vunpack.c.l.bf16 %v713_v19  ;;  %v719_v31 = vunpack.c.h.bf16 %v728_v17  ;;  %v715_v35 = vunpack.c.h.bf16 %v713_v19 }
  0x14   : > { %750 = vmatpush3.bf16.msra.mxu0 %v811_v3  ;;  %778 = vmatpush3.bf16.msra.mxu1 %v811_v3  ;;  %v726_v26 = vunpack.c.l.bf16 %v730_v18  ;;  %v722_v28 = vunpack.c.l.bf16 %v729_v20  ;;  %v727_v32 = vunpack.c.h.bf16 %v730_v18  ;;  %v723_v36 = vunpack.c.h.bf16 %v729_v20 }
  0x15   : > { %751 = vmatprep.subr.bf16.mxu0 %v812_v6  ;;  %771 = vmatprep.subr.bf16.mxu1 %v812_v6 }
  0x18   : > { %752 = vmatpush3.bf16.msra.mxu0 %v812_v6  ;;  %779 = vmatpush3.bf16.msra.mxu1 %v812_v6 }
  0x19   : > { %753 = vmatprep.subr.bf16.mxu0 %v813_v7  ;;  %772 = vmatprep.subr.bf16.mxu1 %v813_v7 }
  0x1c   : > { %754 = vmatpush3.bf16.msra.mxu0 %v813_v7  ;;  %780 = vmatpush3.bf16.msra.mxu1 %v813_v7 }
  0x1d   : > { %755 = vmatprep.subr.bf16.mxu0 %v814_v8  ;;  %773 = vmatprep.subr.bf16.mxu1 %v814_v8 }
  0x20   : > { %756 = vmatpush3.bf16.msra.mxu0 %v814_v8  ;;  %781 = vmatpush3.bf16.msra.mxu1 %v814_v8 }
  0x21   : > { %757 = vmatprep.subr.bf16.mxu0 %v815_v9  ;;  %774 = vmatprep.subr.bf16.mxu1 %v815_v9 }
  0x24   : > { %758 = vmatpush3.bf16.msra.mxu0 %v815_v9  ;;  %782 = vmatpush3.bf16.msra.mxu1 %v815_v9 }
  0x27   : > { %760 = vmatmul.mubr.bf16.vlgmr.msra.gmra.mrb[0].mxu0 %v818_v10  ;;  %764 = vmatmul.mubr.bf16.vlgmr.msra.gmra.mrb[0].mxu1 %v819_v11 }
  0xfa   : > { %v761_v23 = vpop.f32.mrb[0].mxu0  ;;  %v765_v25 = vpop.f32.mrb[0].mxu1 }
  0xfb   : > { %v449_v29 = vpop.f32.mrb[1].mxu0  ;;  %v465_v30 = vpop.f32.mrb[1].mxu1  ;;  %v514_v37 = vmul.f32 %v761_v23, %v511_v21  ;;  %v518_v38 = vmul.f32 %v765_v25, %v511_v21 }
  0xfc   : > { %v762_v33 = vpop.f32.mrb[2].mxu0  ;;  %v766_v34 = vpop.f32.mrb[2].mxu1  ;;  %v512_v41 = vmul.f32 %v511_v21, %v449_v29  ;;  %v516_v42 = vmul.f32 %v511_v21, %v465_v30 }
  0xfd   : > { %v452_v39 = vpop.f32.mrb[3].mxu0  ;;  %v468_v40 = vpop.f32.mrb[3].mxu1  ;;  %v526_v43 = vadd.f32 %v523_v22, %v514_v37  ;;  %v530_v44 = vadd.f32 %v523_v22, %v518_v38  ;;  %v515_v45 = vmul.f32 %v762_v33, %v511_v21  ;;  %v519_v46 = vmul.f32 %v766_v34, %v511_v21 }
  0xfe   : > { %v524_v47 = vadd.f32 %v523_v22, %v512_v41  ;;  %v528_v48 = vadd.f32 %v523_v22, %v516_v42  ;;  %v513_v49 = vmul.f32 %v511_v21, %v452_v39  ;;  %v517_v50 = vmul.f32 %v511_v21, %v468_v40 }
  0xff   : > { %v550_v51 = vadd.f32 %v718_v24, %v526_v43  ;;  %v554_v52 = vadd.f32 %v726_v26, %v530_v44  ;;  %v527_v53 = vadd.f32 %v523_v22, %v515_v45  ;;  %v531_v54 = vadd.f32 %v523_v22, %v519_v46 }
 0x100   : > { %v548_v55 = vadd.f32 %v714_v27, %v524_v47  ;;  %v552_v56 = vadd.f32 %v722_v28, %v528_v48  ;;  %v525_v57 = vadd.f32 %v523_v22, %v513_v49  ;;  %v529_v58 = vadd.f32 %v523_v22, %v517_v50 }
 0x101   : > { %v558_v59 = vmax.f32 %v550_v51, 0.0  ;;  %v562_v60 = vmax.f32 %v554_v52, 0.0  ;;  %v551_v61 = vadd.f32 %v719_v31, %v527_v53  ;;  %v555_v62 = vadd.f32 %v727_v32, %v531_v54 }
 0x102   : > { %v556_v63 = vmax.f32 %v548_v55, 0.0  ;;  %v560_v0 = vmax.f32 %v552_v56, 0.0  ;;  %v549_v1 = vadd.f32 %v715_v35, %v525_v57  ;;  %v553_v2 = vadd.f32 %v723_v36, %v529_v58 }
 0x103   : > { %566 = vst [vmem:[%s287_s26 + $0x10] sm:$0xff] %v558_v59  ;;  %570 = vst [vmem:[%s287_s26 + $0x30] sm:$0xff] %v562_v60  ;;  %v559_v3 = vmax.f32 %v551_v61, 0.0  ;;  %v563_v4 = vmax.f32 %v555_v62, 0.0 }
 0x104   : > { %564 = vst [vmem:[%s287_s26] sm:$0xff] %v556_v63  ;;  %568 = vst [vmem:[%s287_s26 + $0x20] sm:$0xff] %v560_v0  ;;  %v557_v5 = vmax.f32 %v549_v1, 0.0  ;;  %v561_v6 = vmax.f32 %v553_v2, 0.0 }
 0x105   : > { %567 = vst [vmem:[%s287_s26 + $0x18] sm:$0xff] %v559_v3  ;;  %571 = vst [vmem:[%s287_s26 + $0x38] sm:$0xff] %v563_v4 }
 0x106   : > { %565 = vst [vmem:[%s287_s26 + $0x8] sm:$0xff] %v557_v5  ;;  %569 = vst [vmem:[%s287_s26 + $0x28] sm:$0xff] %v561_v6 }
 0x107 PF: > { %s14_s17 = sadd.s32 1, %s842_s17   ;;  %s951_s15 = smov %s838_s16 }
 0x108   : > { %p11_p5 = scmp.ge.s32.totalorder %s14_s17, 4   ;;  %s952_s16 = smov %s954_s18 }
 0x10a   :  { %13 = sbr.rel (!%p11_p5) target bundleno = 2 (0x2), region = 81 }

</bundles_post_ra>
